<compile_context>
chip_gen: v7x
topology: tpu7x:2x2x1
jax: 0.10.0
libtpu: 0.0.40
codegen_flags: <defaults>
</compile_context>

<pallas_src>
import functools

import jax
import jax.numpy as jnp
from jax.experimental import pallas as pl
from jax.experimental.pallas import tpu as pltpu


def _tdl_kernel(tgt_ref, logits_ref, d_ref, out_ref, *, num_valid_rows):
    x = logits_ref[...].astype(jnp.float32)                     # (TB, C)
    tb, c = x.shape

    # Row gather of D on the MXU: one_hot(targets) @ D == D[targets].
    tgt = tgt_ref[...]                                           # (TB, 1) int32
    class_ids = jax.lax.broadcasted_iota(jnp.int32, (tb, c), 1)
    onehot = (class_ids == tgt).astype(jnp.float32)              # (TB, C)
    d_rows = jnp.dot(onehot, d_ref[...],
                     preferred_element_type=jnp.float32,
                     precision=jax.lax.Precision.HIGHEST)        # (TB, C)

    # Numerically stable softmax with the denominator folded into the weighted
    # row sum; the (TB, C) probs tile is never materialized.
    m = jnp.max(x, axis=1, keepdims=True)                        # (TB, 1)  XLU
    e = jnp.exp(x - m)                                           # (TB, C)  EUP

    # Lane sums on the MXU (ones-column matmul); every output lane holds the
    # same per-row sum, so no narrow slices are needed downstream.
    ones_rhs = jnp.ones((c, 128), jnp.float32)
    denom = jnp.dot(e, ones_rhs, preferred_element_type=jnp.float32,
                    precision=jax.lax.Precision.HIGHEST)         # (TB, 128)
    wsum = jnp.dot(e * d_rows, ones_rhs, preferred_element_type=jnp.float32,
                   precision=jax.lax.Precision.HIGHEST)          # (TB, 128)
    per_row = wsum * pl.reciprocal(denom, approx=False)          # (TB, 128)

    # Mask padded batch rows, reduce the tile to one partial sum and write a
    # lane-dense block (unmasked vst, padded rows never reach the epilogue).
    row0 = pl.program_id(0) * tb
    rows = row0 + jax.lax.broadcasted_iota(jnp.int32, (tb, 128), 0)
    per_row = jnp.where(rows < num_valid_rows, per_row, 0.0)
    tile_sum = jnp.sum(per_row, axis=0, keepdims=True)           # (1, 128)
    out_ref[...] = jnp.broadcast_to(tile_sum[:, None, :], out_ref.shape)


def _vmem_capacity_bytes():
    """Physical VMEM of the local TPU generation (fallback: v7x's 64 MiB)."""
    try:
        cap = int(pltpu.get_tpu_info().vmem_capacity_bytes)
        if cap > 0:
            return cap
    except Exception:
        pass
    return 64 << 20


def _pick_batch_tile(B, C, itemsize, capacity):
    """Largest batch tile whose working set (with honest double-buffer
    accounting, D included) stays comfortably inside this generation's VMEM."""
    budget = int(0.55 * capacity)
    d_bytes = 2 * C * C * 4 + C * 128 * 4              # D double-buffered + ones RHS
    per_row = 2 * C * itemsize + 6 * C * 4 + 4 * 128 * 4 + 8
    avail = budget - d_bytes
    if avail < 16 * per_row:
        # TODO(synk): tile D over an extra "arbitrary" grid axis or DMA-gather
        # its rows from HBM instead of requiring full residency.
        raise ValueError(
            f"num_classes={C} too large for a VMEM-resident distance matrix on "
            f"this TPU generation (VMEM capacity {capacity >> 20} MiB)")
    tile = min(avail // per_row, 1024)                  # step overhead amortized
    tile = max(16, (tile // 16) * 16)                   # legal for bf16 tiles too
    b_ceil = ((B + 15) // 16) * 16
    return int(min(tile, b_ceil))


def taxonomic_distance_loss(logits, D, targets, *, batch_tile=None):
    """Pallas implementation of TaxonomicDistanceLoss.forward.

    logits : (B, C) float32 / bfloat16
    D      : (C, C) float distance matrix (the registered buffer)
    targets: (B,)   integer class indices
    returns: scalar float32 loss
    """
    B, C = logits.shape
    assert D.shape == (C, C)

    itemsize = jnp.dtype(logits.dtype).itemsize
    capacity = _vmem_capacity_bytes()

    if batch_tile is None:
        batch_tile = _pick_batch_tile(B, C, itemsize, capacity)
    else:
        batch_tile = max(16, (int(batch_tile) // 16) * 16)
        batch_tile = min(batch_tile, ((B + 15) // 16) * 16)

    num_tiles = pl.cdiv(B, batch_tile)
    B_pad = num_tiles * batch_tile
    if B_pad != B:
        logits = jnp.pad(logits, ((0, B_pad - B), (0, 0)))
        targets = jnp.pad(targets, (0, B_pad - B))

    targets2d = targets.astype(jnp.int32).reshape(B_pad, 1)
    D32 = D.astype(jnp.float32)

    # Honest VMEM accounting: every pipelined input is double-buffered
    # (including the grid-constant D), plus the in-kernel f32 temporaries.
    working = (
        2 * C * C * 4                      # D (double-buffered by the pipeline)
        + C * 128 * 4                      # ones reduction RHS
        + 2 * batch_tile * C * itemsize    # logits (double-buffered)
        + 2 * batch_tile * 4               # targets
        + 2 * 8 * 128 * 4                  # output blocks
        + 6 * batch_tile * C * 4           # f32 temps (x, onehot, d_rows, e, e*d, ...)
        + 4 * batch_tile * 128 * 4         # (TB,128) matmul results / per_row
    )
    vmem_limit = int(min(capacity, max(working + (working >> 2), 32 << 20)))

    cost = pl.CostEstimate(
        flops=int(2 * B_pad * C * C + 4 * B_pad * C * 128 + 8 * B_pad * C),
        transcendentals=int(B_pad * C),
        bytes_accessed=int(B_pad * C * itemsize + 2 * C * C * 4
                           + B_pad * 4 + num_tiles * 8 * 128 * 4),
    )

    kernel = functools.partial(_tdl_kernel, num_valid_rows=B)

    partials = pl.pallas_call(
        kernel,
        out_shape=jax.ShapeDtypeStruct((num_tiles, 8, 128), jnp.float32),
        grid_spec=pltpu.PrefetchScalarGridSpec(
            num_scalar_prefetch=0,
            grid=(num_tiles,),
            in_specs=[
                pl.BlockSpec((batch_tile, 1), lambda i: (i, 0)),   # targets
                pl.BlockSpec((batch_tile, C), lambda i: (i, 0)),   # logits (HBM stream)
                pl.BlockSpec((C, C), lambda i: (0, 0)),            # D (VMEM resident)
            ],
            out_specs=pl.BlockSpec((1, 8, 128), lambda i: (i, 0, 0)),
        ),
        compiler_params=pltpu.CompilerParams(
            dimension_semantics=("parallel",),   # no carried state -> megacore-safe
            vmem_limit_bytes=vmem_limit,
        ),
        cost_estimate=cost,
    )(targets2d, logits, D32)

    # Tiny exact epilogue: one partial sum per tile (padded rows already masked).
    return jnp.sum(partials[:, 0, 0]) / jnp.float32(B)


def _reference(logits, D, targets):
    probs = jax.nn.softmax(logits.astype(jnp.float32), axis=1)
    d_i = jnp.take(D.astype(jnp.float32), targets, axis=0)
    return jnp.mean(jnp.sum(probs * d_i, axis=1))


if __name__ == "__main__":
    key = jax.random.PRNGKey(0)
    k_logits, k_D, k_tgt, k_logits2, k_tgt2 = jax.random.split(key, 5)

    # Small shapes consistent with the module: batch=16, num_classes=128.
    B, C = 16, 128
    logits = jax.random.normal(k_logits, (B, C), dtype=jnp.float32)
    # Deterministic synthetic taxonomic distance matrix: symmetric, zero diagonal.
    raw = jax.random.uniform(k_D, (C, C), dtype=jnp.float32, minval=0.0, maxval=4.0)
    D = 0.5 * (raw + raw.T)
    D = D * (1.0 - jnp.eye(C, dtype=jnp.float32))
    targets = jax.random.randint(k_tgt, (B,), 0, C, dtype=jnp.int32)

    loss = jax.block_until_ready(taxonomic_distance_loss(logits, D, targets))
    ref = _reference(logits, D, targets)
    assert jnp.allclose(loss, ref, rtol=1e-5, atol=1e-5), (loss, ref)

    # Second check: non-divisible batch + multiple grid tiles (exercises padding,
    # in-kernel row masking and the resident-D multi-step path).
    B2 = 100
    logits2 = jax.random.normal(k_logits2, (B2, C), dtype=jnp.float32)
    targets2 = jax.random.randint(k_tgt2, (B2,), 0, C, dtype=jnp.int32)
    loss2 = jax.block_until_ready(
        taxonomic_distance_loss(logits2, D, targets2, batch_tile=32))
    ref2 = _reference(logits2, D, targets2)
    assert jnp.allclose(loss2, ref2, rtol=1e-5, atol=1e-5), (loss2, ref2)

    print("KERNEL_OK")
</pallas_src>

<mosaic_0001>
module attributes {stable_mosaic.version = 11 : i64} {
  func.func @_tdl_kernel(%arg0: i32, %arg1: memref<16x1xi32, #tpu.memory_space<vmem>>, %arg2: memref<16x128xf32, #tpu.memory_space<vmem>>, %arg3: memref<128x128xf32, #tpu.memory_space<vmem>>, %arg4: memref<1x8x128xf32, #tpu.memory_space<vmem>>) attributes {dimension_semantics = [#tpu.dimension_semantics<parallel>], iteration_bounds = array<i64: 1>, scalar_prefetch = 0 : i64, scratch_operands = 0 : i64, tpu.core_type = #tpu.core_type<tc>, window_params = [{transform_indices = @transform_0, window_bounds = array<i64: 16, 1>}, {transform_indices = @transform_1, window_bounds = array<i64: 16, 128>}, {pipeline_mode = #tpu.pipeline_mode<synchronous>, transform_indices = @transform_2, window_bounds = array<i64: 128, 128>}, {transform_indices = @transform_3, window_bounds = array<i64: 1, 8, 128>}]} {
    %c0 = arith.constant 0 : index
    %c0_0 = arith.constant 0 : index
    %0 = vector.load %arg2[%c0, %c0_0] : memref<16x128xf32, #tpu.memory_space<vmem>>, vector<16x128xf32>
    %c0_1 = arith.constant 0 : index
    %c0_2 = arith.constant 0 : index
    %1 = vector.load %arg1[%c0_1, %c0_2] : memref<16x1xi32, #tpu.memory_space<vmem>>, vector<16x1xi32>
    %2 = tpu.iota {dimensions = array<i32: 1>} : vector<16x128xi32>
    %3 = vector.broadcast %1 : vector<16x1xi32> to vector<16x128xi32>
    %4 = arith.cmpi eq, %2, %3 : vector<16x128xi32>
    %5 = arith.extui %4 : vector<16x128xi1> to vector<16x128xi32>
    %6 = arith.sitofp %5 : vector<16x128xi32> to vector<16x128xf32>
    %c0_3 = arith.constant 0 : index
    %c0_4 = arith.constant 0 : index
    %7 = vector.load %arg3[%c0_3, %c0_4] : memref<128x128xf32, #tpu.memory_space<vmem>>, vector<128x128xf32>
    %cst = arith.constant dense<0.000000e+00> : vector<16x128xf32>
    %8 = tpu.matmul %6, %7, %cst {dimension_numbers = #tpu.dot_dimension_numbers<[1], [0], [0], [1], [0, 0, 1, 1], [], []>, precision = #tpu.contract_precision<fp32>} : vector<16x128xf32>, vector<128x128xf32>, vector<16x128xf32> -> vector<16x128xf32>
    %cst_5 = arith.constant dense<0xFF800000> : vector<16xf32>
    %9 = vector.multi_reduction <maximumf>, %0, %cst_5 [1] : vector<16x128xf32> to vector<16xf32>
    %10 = vector.shape_cast %9 : vector<16xf32> to vector<16x1xf32>
    %11 = vector.broadcast %10 : vector<16x1xf32> to vector<16x128xf32>
    %12 = arith.subf %0, %11 : vector<16x128xf32>
    %13 = math.exp %12 : vector<16x128xf32>
    %cst_6 = arith.constant 1.000000e+00 : f32
    %14 = vector.broadcast %cst_6 : f32 to vector<128x128xf32>
    %cst_7 = arith.constant dense<0.000000e+00> : vector<16x128xf32>
    %15 = tpu.matmul %13, %14, %cst_7 {dimension_numbers = #tpu.dot_dimension_numbers<[1], [0], [0], [1], [0, 0, 1, 1], [], []>, precision = #tpu.contract_precision<fp32>} : vector<16x128xf32>, vector<128x128xf32>, vector<16x128xf32> -> vector<16x128xf32>
    %16 = arith.mulf %13, %8 : vector<16x128xf32>
    %cst_8 = arith.constant dense<0.000000e+00> : vector<16x128xf32>
    %17 = tpu.matmul %16, %14, %cst_8 {dimension_numbers = #tpu.dot_dimension_numbers<[1], [0], [0], [1], [0, 0, 1, 1], [], []>, precision = #tpu.contract_precision<fp32>} : vector<16x128xf32>, vector<128x128xf32>, vector<16x128xf32> -> vector<16x128xf32>
    %18 = tpu.reciprocal %15 : vector<16x128xf32> -> vector<16x128xf32>
    %19 = arith.mulf %17, %18 : vector<16x128xf32>
    %c16_i32 = arith.constant 16 : i32
    %20 = arith.muli %arg0, %c16_i32 : i32
    %21 = tpu.iota {dimensions = array<i32: 0>} : vector<16x128xi32>
    %22 = vector.broadcast %20 : i32 to vector<16x128xi32>
    %23 = arith.addi %22, %21 : vector<16x128xi32>
    %c16_i32_9 = arith.constant 16 : i32
    %24 = vector.broadcast %c16_i32_9 : i32 to vector<16x128xi32>
    %25 = arith.cmpi slt, %23, %24 : vector<16x128xi32>
    %cst_10 = arith.constant 0.000000e+00 : f32
    %26 = vector.broadcast %cst_10 : f32 to vector<16x128xf32>
    %27 = arith.select %25, %19, %26 : vector<16x128xi1>, vector<16x128xf32>
    %cst_11 = arith.constant dense<0.000000e+00> : vector<128xf32>
    %28 = vector.multi_reduction <add>, %27, %cst_11 [0] : vector<16x128xf32> to vector<128xf32>
    %29 = vector.shape_cast %28 : vector<128xf32> to vector<1x128xf32>
    %30 = vector.shape_cast %29 : vector<1x128xf32> to vector<1x1x128xf32>
    %31 = vector.shape_cast %30 : vector<1x1x128xf32> to vector<1x1x128xf32>
    %32 = vector.broadcast %31 : vector<1x1x128xf32> to vector<1x8x128xf32>
    %c0_12 = arith.constant 0 : index
    %c0_13 = arith.constant 0 : index
    %c0_14 = arith.constant 0 : index
    %33 = vector.load %arg4[%c0_12, %c0_13, %c0_14] : memref<1x8x128xf32, #tpu.memory_space<vmem>>, vector<1x8x128xf32>
    tpu.vector_store %arg4[%c0_12, %c0_13, %c0_14], %32 {strides = array<i32>} : memref<1x8x128xf32, #tpu.memory_space<vmem>>, vector<1x8x128xf32>,
    return
  }
  func.func @transform_0(%arg0: i32) -> (i32, i32) {
    %c0_i32 = arith.constant 0 : i32
    %c0_i32_0 = arith.constant 0 : i32
    return %arg0, %c0_i32 : i32, i32
  }
  func.func @transform_1(%arg0: i32) -> (i32, i32) {
    %c0_i32 = arith.constant 0 : i32
    %c0_i32_0 = arith.constant 0 : i32
    return %arg0, %c0_i32 : i32, i32
  }
  func.func @transform_2(%arg0: i32) -> (i32, i32) {
    %c0_i32 = arith.constant 0 : i32
    %c0_i32_0 = arith.constant 0 : i32
    %c0_i32_1 = arith.constant 0 : i32
    return %c0_i32, %c0_i32_0 : i32, i32
  }
  func.func @transform_3(%arg0: i32) -> (i32, i32, i32) {
    %c0_i32 = arith.constant 0 : i32
    %c0_i32_0 = arith.constant 0 : i32
    %c0_i32_1 = arith.constant 0 : i32
    return %arg0, %c0_i32, %c0_i32_0 : i32, i32, i32
  }
}

</mosaic_0001>

<bundles_post_ra>
// kernel: tpu_custom_call.1
= control target key start
LH: loop header
LB: loop body
LE: loop exit
PB: predicated region body
PF: predicated region fallthrough
CT: control target
= control target key end

     0   :  { %8 = vsyncpa [#allocation3], 0  ;;  %s3342_s0 = inlined_call_operand.vmem [shape: s32[16,1], index: 0, kind: input, shape index: {}]   ;;  %s3343_s1 = inlined_call_operand.vmem [shape: f32[16,128], index: 1, kind: input, shape index: {}]   ;;  %s3344_s2 = inlined_call_operand.hbm [shape: f32[128,128], index: 2, kind: input, shape index: {}]   ;;  %s3345_s3 = inlined_call_operand.hbm [shape: f32[1,8,128], index: 3, kind: output, shape index: {}]  }
   0x1   :  { %9 = vsyncpa [#allocation4], 0  ;;  %s2824_s12 = smov [#allocation2]   ;;  %s2776_s16 = scalar_lea.hbm %s3344_s2, 2048 }
   0x2   :  { %s19_s13 = sshll.u32 %s2824_s12, 4  ;;  %p2777_p0 = scmp.ne.s32.totalorder %s3344_s2, %s2776_s16  ;;  %s20_s13 = int_to_ptr.vmem [resolvable:$true] %s19_s13 }
   0x3   :  { %p2780_p1 = scmp.lt.u32.totalorder %s2776_s16, %s3344_s2 }
   0x5   :  { %p2782_p2 = pnand %p2780_p1, %p2777_p0 }
   0x7   :  { %2785 = shalt.err (!%p2782_p2)
}
   0x8   :  { %s2786_s21 = scalar_lea.vmem %s20_s13, 2048  ;;  %p2791_p4 = scmp.lt.s32.totalorder %s20_s13, %s20_s13 }
   0x9   :  { %p2787_p3 = scmp.ne.s32.totalorder %s20_s13, %s2786_s21  ;;  %p2792_p5 = scmp.lt.s32.totalorder %s2786_s21, %s2786_s21 }
   0xb   :  { %p2793_p6 = por %p2792_p5, %p2791_p4 }
   0xd   :  { %p2794_p7 = pnand %p2793_p6, %p2787_p3 }
   0xf   :  { %2797 = shalt.err (!%p2794_p7)
}
  0x10   :  { %s2825_s22 = smov 128   ;;  %s2826_s23 = smov 8  }
  0x11   :  { %25 = dma.hbm_to_vmem [thread:$0]  %s3344_s2, 2048, %s20_s13, [#allocation3], %s2825_s22, %s2825_s22, %s2826_s23  }
  0x12   :  { %2820 = dma.done.wait [#allocation3], 2048  }
  0x13   :  { %2821 = vsyncadd [#allocation3], 4294965248  ;;  %v2827_v0 = vmov 0   ;;  %v31_v1 = vld [vmem:[%s3342_s0] sm:$0xff]  ;;  %v48_v3 = vld [vmem:[#allocation2 + $0x8] sm:$0xff] }
  0x14   :  { %2767 = vset.pattern.permute.xlu0 %v2827_v0  ;;  %v47_v2 = vld [vmem:[#allocation2] sm:$0xff]  ;;  %v49_v5 = vld [vmem:[#allocation2 + $0x10] sm:$0xff]  ;;  %v50_v6 = vld [vmem:[#allocation2 + $0x18] sm:$0xff]  ;;  %v67_v8 = vand.u32 4294901760, %v48_v3 }
  0x15   :  { %36 = vperm.xlu0 %2767, %v31_v1   ;;  %v64_v4 = vand.u32 4294901760, %v47_v2  ;;  %v32_v7 = vld [vmem:[%s3342_s0 + $0x8] sm:$0xff]  ;;  %v70_v9 = vand.u32 4294901760, %v49_v5  ;;  %v73_v10 = vand.u32 4294901760, %v50_v6  ;;  %v51_v11 = vld [vmem:[#allocation2 + $0x20] sm:$0xff]  ;;  %v53_v17 = vld [vmem:[#allocation2 + $0x30] sm:$0xff] }
  0x16   :  { %v52_v12 = vld [vmem:[#allocation2 + $0x28] sm:$0xff]  ;;  %v76_v15 = vand.u32 4294901760, %v51_v11  ;;  %v54_v18 = vld [vmem:[#allocation2 + $0x38] sm:$0xff]  ;;  %v82_v20 = vand.u32 4294901760, %v53_v17  ;;  %v55_v22 = vld [vmem:[#allocation2 + $0x40] sm:$0xff]  ;;  %v2906_v46 = vsub.f32 %v48_v3, %v67_v8 }
  0x17   :  { %v2870_v13 = vpack.c.bf16 %v67_v8, %v64_v4  ;;  %v2872_v14 = vpack.c.bf16 %v73_v10, %v70_v9  ;;  %v79_v16 = vand.u32 4294901760, %v52_v12  ;;  %v85_v21 = vand.u32 4294901760, %v54_v18  ;;  %v56_v23 = vld [vmem:[#allocation2 + $0x48] sm:$0xff]  ;;  %v57_v26 = vld [vmem:[#allocation2 + $0x50] sm:$0xff]  ;;  %v58_v32 = vld [vmem:[#allocation2 + $0x58] sm:$0xff] }
  0x18   :  { %v2879_v24 = vsub.f32 %v49_v5, %v70_v9  ;;  %v2881_v25 = vsub.f32 %v50_v6, %v73_v10  ;;  %v88_v30 = vand.u32 4294901760, %v55_v22  ;;  %v91_v31 = vand.u32 4294901760, %v56_v23  ;;  %v59_v39 = vld [vmem:[#allocation2 + $0x60] sm:$0xff]  ;;  %v60_v44 = vld [vmem:[#allocation2 + $0x68] sm:$0xff]  ;;  %v61_v55 = vld [vmem:[#allocation2 + $0x70] sm:$0xff] }
  0x19   :  { %39 = vperm.xlu0 %2767, %v32_v7   ;;  %2442 = vmatprep.subr.bf16.mxu0 %v2870_v13  ;;  %v2877_v19 = vpack.c.bf16 %v79_v16, %v76_v15  ;;  %v2887_v29 = vpack.c.bf16 %v85_v21, %v82_v20  ;;  %v2895_v35 = vsub.f32 %v51_v11, %v76_v15  ;;  %v94_v36 = vand.u32 4294901760, %v57_v26  ;;  %v62_v63 = vld [vmem:[#allocation2 + $0x78] sm:$0xff] }
  0x1a   :  { %2444 = vmatpush3.bf16.msra.mxu0 %v2870_v13  ;;  %v181_v27 = vand.u32 4294901760, %v2879_v24  ;;  %v188_v28 = vand.u32 4294901760, %v2881_v25  ;;  %v2897_v37 = vsub.f32 %v52_v12, %v79_v16  ;;  %v97_v38 = vand.u32 4294901760, %v58_v32 }
  0x1b   :  { %2446 = vmatprep.subr.bf16.mxu0 %v2872_v14  ;;  %v195_v42 = vand.u32 4294901760, %v2895_v35  ;;  %v2902_v43 = vpack.c.bf16 %v91_v31, %v88_v30  ;;  %v2904_v45 = vsub.f32 %v47_v2, %v64_v4  ;;  %v2914_v50 = vsub.f32 %v53_v17, %v82_v20 }
  0x1c   :  { %v182_v33 = vsub.f32 %v2879_v24, %v181_v27  ;;  %v189_v34 = vsub.f32 %v2881_v25, %v188_v28  ;;  %v202_v47 = vand.u32 4294901760, %v2897_v37  ;;  %v2916_v51 = vsub.f32 %v54_v18, %v85_v21 }
  0x1d   :  { %v196_v49 = vsub.f32 %v2895_v35, %v195_v42  ;;  %v100_v52 = vand.u32 4294901760, %v59_v39  ;;  %v103_v54 = vand.u32 4294901760, %v60_v44  ;;  %v209_v57 = vand.u32 4294901760, %v2914_v50 }
  0x1e   :  { %2448 = vmatpush3.bf16.msra.mxu0 %v2872_v14  ;;  %v183_v40 = vand.u32 4294901760, %v182_v33  ;;  %v190_v41 = vand.u32 4294901760, %v189_v34  ;;  %v203_v53 = vsub.f32 %v2897_v37, %v202_v47  ;;  %v216_v58 = vand.u32 4294901760, %v2916_v51 }
  0x1f   :  { %2450 = vmatprep.subr.bf16.mxu0 %v2877_v19  ;;  %v197_v56 = vand.u32 4294901760, %v196_v49  ;;  %v2925_v59 = vpack.c.bf16 %v97_v38, %v94_v36  ;;  %v167_v60 = vand.u32 4294901760, %v2904_v45  ;;  %v174_v61 = vand.u32 4294901760, %v2906_v46 }
  0x20   :  { %v2909_v48 = vpack.c.bf16 %v190_v41, %v183_v40  ;;  %v204_v62 = vand.u32 4294901760, %v203_v53  ;;  %v210_v0 = vsub.f32 %v2914_v50, %v209_v57  ;;  %v217_v1 = vsub.f32 %v2916_v51, %v216_v58 }
  0x21   :  { %v2935_v2 = vsub.f32 %v55_v22, %v88_v30  ;;  %v2937_v3 = vsub.f32 %v56_v23, %v91_v31  ;;  %v106_v4 = vand.u32 4294901760, %v61_v55  ;;  %v2945_v10 = vpack.c.bf16 %v103_v54, %v100_v52 }
  0x22   :  { %2452 = vmatpush3.bf16.msra.mxu0 %v2877_v19  ;;  %v2939_v5 = vpack.c.bf16 %v204_v62, %v197_v56  ;;  %v211_v6 = vand.u32 4294901760, %v210_v0  ;;  %v218_v7 = vand.u32 4294901760, %v217_v1  ;;  %v109_v11 = vand.u32 4294901760, %v62_v63 }
  0x23   :  { %2454 = vmatprep.subr.bf16.mxu0 %v2887_v29  ;;  %v3353_v8 = vand.u32 4294901760, %v2935_v2  ;;  %v3352_v9 = vand.u32 4294901760, %v2937_v3  ;;  %v168_v12 = vsub.f32 %v2904_v45, %v167_v60  ;;  %v175_v15 = vsub.f32 %v2906_v46, %v174_v61 }
  0x24   :  { %v2953_v16 = vpack.c.bf16 %v218_v7, %v211_v6  ;;  %v2961_v20 = vsub.f32 %v57_v26, %v94_v36  ;;  %v2963_v21 = vsub.f32 %v58_v32, %v97_v38  ;;  %v2968_v31 = vpack.c.bf16 %v109_v11, %v106_v4 }
  0x25   :  { %v224_v17 = vsub.f32 %v2935_v2, %v3353_v8  ;;  %v231_v18 = vsub.f32 %v2937_v3, %v3352_v9  ;;  %v169_v33 = vand.u32 4294901760, %v168_v12  ;;  %v176_v34 = vand.u32 4294901760, %v175_v15 }
  0x26   :  { %2456 = vmatpush3.bf16.msra.mxu0 %v2887_v29  ;;  %v3351_v30 = vand.u32 4294901760, %v2961_v20  ;;  %v3350_v40 = vand.u32 4294901760, %v2963_v21  ;;  %v2976_v32 = vsub.f32 %v59_v39, %v100_v52  ;;  %v2978_v36 = vsub.f32 %v60_v44, %v103_v54 }
  0x27   :  { %2458 = vmatprep.subr.bf16.mxu0 %v2902_v43  ;;  %v225_v22 = vand.u32 4294901760, %v224_v17  ;;  %v232_v23 = vand.u32 4294901760, %v231_v18  ;;  %v2473_v62 = vpack.c.bf16 %v176_v34, %v169_v33  ;;  %v2993_v52 = vsub.f32 %v61_v55, %v106_v4 }
  0x28   :  { %v238_v26 = vsub.f32 %v2961_v20, %v3351_v30  ;;  %v245_v38 = vsub.f32 %v2963_v21, %v3350_v40  ;;  %v3349_v53 = vand.u32 4294901760, %v2976_v32  ;;  %v3348_v56 = vand.u32 4294901760, %v2978_v36 }
  0x29   :  { %v2971_v41 = vpack.c.bf16 %v232_v23, %v225_v22  ;;  %v2995_v54 = vsub.f32 %v62_v63, %v109_v11  ;;  %v3347_v12 = vand.u32 4294901760, %v2993_v52  ;;  %v2505_v22 = vpack.c.bf16 %v2906_v46, %v2904_v45 }
  0x2a   :  { %2460 = vmatpush3.bf16.msra.mxu0 %v2902_v43  ;;  %v239_v49 = vand.u32 4294901760, %v238_v26  ;;  %v246_v0 = vand.u32 4294901760, %v245_v38  ;;  %v252_v39 = vsub.f32 %v2976_v32, %v3349_v53  ;;  %v259_v44 = vsub.f32 %v2978_v36, %v3348_v56  ;;  %v3021_v38 = vld [vmem:[%s3343_s1] sm:$0xff] }
  0x2b   :  { %2462 = vmatprep.subr.bf16.mxu0 %v2925_v59  ;;  %v3346_v15 = vand.u32 4294901760, %v2995_v54  ;;  %v266_v18 = vsub.f32 %v2993_v52, %v3347_v12  ;;  %v2509_v23 = vpack.c.bf16 %v2881_v25, %v2879_v24  ;;  %v2513_v33 = vpack.c.bf16 %v2897_v37, %v2895_v35  ;;  %747 = vmax.xlane.f32.xlu1 %v3021_v38 }
  0x2c   :  { %v2493_v1 = vpack.c.bf16 %v246_v0, %v239_v49  ;;  %v253_v6 = vand.u32 4294901760, %v252_v39  ;;  %v260_v7 = vand.u32 4294901760, %v259_v44  ;;  %v2517_v34 = vpack.c.bf16 %v2916_v51, %v2914_v50  ;;  %v3031_v0 = vld [vmem:[%s3343_s1 + $0x8] sm:$0xff]  ;;  %s2831_s1 = smov [#allocation5]  }
  0x2d   :  { %v273_v55 = vsub.f32 %v2995_v54, %v3346_v15  ;;  %v267_v63 = vand.u32 4294901760, %v266_v18  ;;  %v3016_v26 = vpack.c.bf16 %v2937_v3, %v2935_v2  ;;  %v3026_v49 = vpack.c.bf16 %v2963_v21, %v2961_v20  ;;  %s1740_s5 = sshll.u32 %s2831_s1, 4  ;;  %s1741_s5 = int_to_ptr.vmem [resolvable:$true] %s1740_s5 }
  0x2e   :  { %2464 = vmatpush3.bf16.msra.mxu0 %v2925_v59  ;;  %v2497_v17 = vpack.c.bf16 %v260_v7, %v253_v6  ;;  %v3036_v39 = vpack.c.bf16 %v2978_v36, %v2976_v32  ;;  %v3040_v44 = vpack.c.bf16 %v2995_v54, %v2993_v52  ;;  %v33_v6 = vlaneseq  ;;  %s2798_s6 = scalar_lea.vmem %s1741_s5, 128  ;;  %p2803_p9 = scmp.lt.s32.totalorder %s1741_s5, %s1741_s5 }
  0x2f   :  { %2466 = vmatprep.subr.bf16.mxu0 %v2945_v10  ;;  %v274_v4 = vand.u32 4294901760, %v273_v55  ;;  %749 = vmax.xlane.f32.xlu1 %v3031_v0  ;;  %v2828_v55 = vmov 0.0   ;;  %v2829_v8 = vmov 1.0   ;;  %v2577_v24 = vpack.c.bf16 %v202_v47, %v195_v42  ;;  %p2799_p8 = scmp.ne.s32.totalorder %s1741_s5, %s2798_s6  ;;  %p2804_p10 = scmp.lt.s32.totalorder %s2798_s6, %s2798_s6 }
  0x30   :  { %v3042_v7 = vand.u32 127, %v33_v6  ;;  %v2581_v25 = vpack.c.bf16 %v216_v58, %v209_v57  ;;  %v3356_v37 = vand.u32 4294901760, %v2961_v20  ;;  %v3357_v42 = vand.u32 4294901760, %v2963_v21 }
  0x31   :  { %v2501_v11 = vpack.c.bf16 %v274_v4, %v267_v63  ;;  %v3358_v46 = vand.u32 4294901760, %v2976_v32  ;;  %v3359_v47 = vand.u32 4294901760, %v2978_v36  ;;  %v3360_v51 = vand.u32 4294901760, %v2993_v52  ;;  %p2805_p11 = por %p2804_p10, %p2803_p9 }
  0x32   :  { %2468 = vmatpush3.bf16.msra.mxu0 %v2945_v10  ;;  %v2589_v45 = vpack.c.bf16 %v3357_v42, %v3356_v37  ;;  %v3361_v57 = vand.u32 4294901760, %v2995_v54 }
  0x33   :  { %2470 = vmatprep.subr.bf16.mxu0 %v2968_v31  ;;  %v2593_v50 = vpack.c.bf16 %v3359_v47, %v3358_v46  ;;  %p2806_p12 = pnand %p2805_p11, %p2799_p8 }
  0x34   :  { %v2597_v58 = vpack.c.bf16 %v3361_v57, %v3360_v51 }
  0x36   :  { %2472 = vmatpush3.bf16.msra.mxu0 %v2968_v31 }
  0x37   :  { %2474 = vmatprep.subr.bf16.mxu0 %v2473_v62 }
  0x94   :  { %v3044_v18 = vpop.permute.xlu0 %36 }
  0x95   :  { %vm41_vm0 = vcmp.eq.s32.totalorder %v3042_v7, %v3044_v18 }
  0x96   :  { %v1749_v63 = vsel %vm41_vm0, 1.0, %v2828_v55 }
  0x97   :  { %v3052_v4 = vsub.f32 %v1749_v63, %v1749_v63 }
  0x98   :  { %v3054_v15 = vpop.permute.xlu0 %39 }
  0x99   :  { %vm42_vm1 = vcmp.eq.s32.totalorder %v3042_v7, %v3054_v15  ;;  %v146_v6 = vand.u32 4294901760, %v3052_v4 }
  0x9a   :  { %v1750_v12 = vsel %vm42_vm1, 1.0, %v2828_v55 }
  0x9b   :  { %v3063_v56 = vsub.f32 %v1750_v12, %v1750_v12  ;;  %v147_v53 = vsub.f32 %v3052_v4, %v146_v6 }
  0x9d   :  { %v148_v63 = vand.u32 4294901760, %v147_v53  ;;  %v156_v40 = vand.u32 4294901760, %v3063_v56 }
  0x9f   :  { %2023 = vmatprep.mubr.f32.mxu0 %v148_v63  ;;  %v157_v30 = vsub.f32 %v3063_v56, %v156_v40 }
  0xa1   :  { %v158_v9 = vand.u32 4294901760, %v157_v30 }
  0xa3   :  { %2024 = vmatmul.mubr.f32.vlgmr.msra.gmra.mrb[0].mxu0 %v158_v9 }
  0xa4   :  { %2476 = vmatpush3.bf16.msra.mxu0 %v2473_v62  ;;  %2058 = vmatprep.mubr.msk.f32.mxu0 %vm41_vm0, %v2829_v8 }
  0xa5   :  { %2478 = vmatprep.subr.bf16.mxu0 %v2909_v48 }
  0xa8   :  { %2480 = vmatpush3.bf16.msra.mxu0 %v2909_v48  ;;  %v2830_v48 = vmov 1.0|1.0  }
  0xa9   :  { %2482 = vmatprep.subr.bf16.mxu0 %v2939_v5  ;;  %2633 = vmatprep.subr.bf16.mxu1 %v2830_v48 }
  0xaa   :  { %2634 = vmatpush3.bf16.msra.mxu1 %v2830_v48 }
  0xab   :  { %2635 = vmatprep.subr.bf16.mxu1 %v2830_v48 }
  0xac   :  { %2484 = vmatpush3.bf16.msra.mxu0 %v2939_v5 }
  0xad   :  { %2486 = vmatprep.subr.bf16.mxu0 %v2953_v16 }
  0xae   :  { %2636 = vmatpush3.bf16.msra.mxu1 %v2830_v48 }
  0xaf   :  { %2637 = vmatprep.subr.bf16.mxu1 %v2830_v48 }
  0xb0   :  { %2488 = vmatpush3.bf16.msra.mxu0 %v2953_v16 }
  0xb1   :  { %2490 = vmatprep.subr.bf16.mxu0 %v2971_v41 }
  0xb2   :  { %2638 = vmatpush3.bf16.msra.mxu1 %v2830_v48 }
  0xb3   :  { %2639 = vmatprep.subr.bf16.mxu1 %v2830_v48 }
  0xb4   :  { %2492 = vmatpush3.bf16.msra.mxu0 %v2971_v41 }
  0xb5   :  { %2494 = vmatprep.subr.bf16.mxu0 %v2493_v1 }
  0xb6   :  { %2640 = vmatpush3.bf16.msra.mxu1 %v2830_v48 }
  0xb7   :  { %2641 = vmatprep.subr.bf16.mxu1 %v2830_v48 }
  0xb8   :  { %2496 = vmatpush3.bf16.msra.mxu0 %v2493_v1  ;;  %v748_v5 = vpop.xlane.xlu1 %747 }
  0xb9   :  { %2498 = vmatprep.subr.bf16.mxu0 %v2497_v17  ;;  %v751_v9 = vsub.f32 %v3021_v38, %v748_v5 }
  0xba   :  { %2642 = vmatpush3.bf16.msra.mxu1 %v2830_v48 }
  0xbb   :  { %2643 = vmatprep.subr.bf16.mxu1 %v2830_v48  ;;  %v753_v16 = vmul.f32 1.442695, %v751_v9 }
  0xbc   :  { %2500 = vmatpush3.bf16.msra.mxu0 %v2497_v17  ;;  %v750_v30 = vpop.xlane.xlu1 %749 }
  0xbd   :  { %2502 = vmatprep.subr.bf16.mxu0 %v2501_v11  ;;  %2768 = vpow2.f32 %v753_v16  ;;  %v752_v41 = vsub.f32 %v3031_v0, %v750_v30  ;;  %v2569_v0 = vpack.c.bf16 %v174_v61, %v167_v60 }
  0xbe   :  { %2644 = vmatpush3.bf16.msra.mxu1 %v2830_v48 }
  0xbf   :  { %2645 = vmatprep.subr.bf16.mxu1 %v2830_v48  ;;  %v755_v53 = vmul.f32 1.442695, %v752_v41 }
  0xc0   :  { %2504 = vmatpush3.bf16.msra.mxu0 %v2501_v11 }
  0xc1   :  { %2506 = vmatprep.subr.bf16.mxu0 %v2505_v22  ;;  %2770 = vpow2.f32 %v755_v53 }
  0xc2   :  { %2646 = vmatpush3.bf16.msra.mxu1 %v2830_v48 }
  0xc3   :  { %2059 = vmatmul.mubr.msk.f32.vlgmr.msra.gmra.mrb[0].mxu0 %vm42_vm1, %v2829_v8  ;;  %2647 = vmatprep.subr.bf16.mxu1 %v2830_v48 }
  0xc4   :  { %2508 = vmatpush3.bf16.msra.mxu0 %v2505_v22  ;;  %2093 = vmatprep.mubr.f32.mxu0 %v3052_v4 }
  0xc5   :  { %2510 = vmatprep.subr.bf16.mxu0 %v2509_v23 }
  0xc6   :  { %2648 = vmatpush3.bf16.msra.mxu1 %v2830_v48 }
  0xc7   :  { %2649 = vmatprep.subr.bf16.mxu1 %v2830_v48  ;;  %v3126_v62 = vpop.eup %2768 }
  0xc8   :  { %2512 = vmatpush3.bf16.msra.mxu0 %v2509_v23  ;;  %v3129_v1 = vand.u32 4294901760, %v3126_v62 }
  0xc9   :  { %2514 = vmatprep.subr.bf16.mxu0 %v2513_v33 }
  0xca   :  { %v3135_v12 = vsub.f32 %v3126_v62, %v3129_v1 }
  0xcb   :  { %v3137_v17 = vpop.eup %2770 }
  0xcc   :  { %2516 = vmatpush3.bf16.msra.mxu0 %v2513_v33  ;;  %v824_v11 = vand.u32 4294901760, %v3135_v12  ;;  %v3141_v22 = vand.u32 4294901760, %v3137_v17 }
  0xcd   :  { %2518 = vmatprep.subr.bf16.mxu0 %v2517_v34 }
  0xce   :  { %v825_v23 = vsub.f32 %v3135_v12, %v824_v11  ;;  %v3148_v33 = vsub.f32 %v3137_v17, %v3141_v22 }
  0xd0   :  { %2520 = vmatpush3.bf16.msra.mxu0 %v2517_v34  ;;  %v826_v34 = vand.u32 4294901760, %v825_v23 }
  0xd1   :  { %2522 = vmatprep.subr.bf16.mxu0 %v3016_v26 }
  0xd2   :  { %2233 = vmatprep.mubr.f32.mxu1 %v826_v34 }
  0xd4   :  { %2524 = vmatpush3.bf16.msra.mxu0 %v3016_v26  ;;  %v834_v26 = vand.u32 4294901760, %v3148_v33 }
  0xd5   :  { %2526 = vmatprep.subr.bf16.mxu0 %v3026_v49 }
  0xd6   :  { %v835_v38 = vsub.f32 %v3148_v33, %v834_v26 }
  0xd8   :  { %2528 = vmatpush3.bf16.msra.mxu0 %v3026_v49  ;;  %v836_v49 = vand.u32 4294901760, %v835_v38 }
  0xd9   :  { %2530 = vmatprep.subr.bf16.mxu0 %v3036_v39 }
  0xda   :  { %2234 = vmatmul.mubr.f32.vlgmr.msra.gmra.mrb[0].mxu1 %v836_v49 }
  0xdb   :  { %2650 = vmatpush3.bf16.msra.mxu1 %v2830_v48  ;;  %2278 = vmatprep.mubr.f32.mxu1 %v824_v11 }
  0xdc   :  { %2532 = vmatpush3.bf16.msra.mxu0 %v3036_v39  ;;  %2651 = vmatprep.subr.bf16.mxu1 %v2830_v48  ;;  %v2573_v39 = vpack.c.bf16 %v188_v28, %v181_v27  ;;  %v3354_v27 = vand.u32 4294901760, %v2935_v2  ;;  %v3355_v28 = vand.u32 4294901760, %v2937_v3 }
  0xdd   :  { %2534 = vmatprep.subr.bf16.mxu0 %v3040_v44 }
  0xde   :  { %v2585_v35 = vpack.c.bf16 %v3355_v28, %v3354_v27 }
  0xdf   :  { %2652 = vmatpush3.bf16.msra.mxu1 %v2830_v48 }
  0xe0   :  { %2536 = vmatpush3.bf16.msra.mxu0 %v3040_v44  ;;  %2653 = vmatprep.subr.bf16.mxu1 %v2830_v48 }
  0xe1   :  { %2538 = vmatprep.subr.bf16.mxu0 %v2870_v13 }
  0xe3   :  { %2094 = vmatmul.mubr.f32.vlgmr.msra.gmra.mrb[0].mxu0 %v3063_v56  ;;  %2654 = vmatpush3.bf16.msra.mxu1 %v2830_v48 }
  0xe4   :  { %2540 = vmatpush3.bf16.msra.mxu0 %v2870_v13  ;;  %2128 = vmatprep.mubr.f32.mxu0 %v146_v6 }
  0xe5   :  { %2542 = vmatprep.subr.bf16.mxu0 %v2872_v14  ;;  %2655 = vmatprep.subr.bf16.mxu1 %v2830_v48 }
  0xe7   :  { %2656 = vmatpush3.bf16.msra.mxu1 %v2830_v48 }
  0xe8   :  { %2544 = vmatpush3.bf16.msra.mxu0 %v2872_v14  ;;  %2657 = vmatprep.subr.bf16.mxu1 %v2830_v48 }
  0xe9   :  { %2546 = vmatprep.subr.bf16.mxu0 %v2877_v19 }
  0xeb   :  { %2658 = vmatpush3.bf16.msra.mxu1 %v2830_v48 }
  0xec   :  { %2548 = vmatpush3.bf16.msra.mxu0 %v2877_v19  ;;  %2659 = vmatprep.subr.bf16.mxu1 %v2830_v48 }
  0xed   :  { %2550 = vmatprep.subr.bf16.mxu0 %v2887_v29 }
  0xef   :  { %2660 = vmatpush3.bf16.msra.mxu1 %v2830_v48 }
  0xf0   :  { %2552 = vmatpush3.bf16.msra.mxu0 %v2887_v29  ;;  %2661 = vmatprep.subr.bf16.mxu1 %v2830_v48 }
  0xf1   :  { %2554 = vmatprep.subr.bf16.mxu0 %v2902_v43 }
  0xf3   :  { %2662 = vmatpush3.bf16.msra.mxu1 %v2830_v48 }
  0xf4   :  { %2556 = vmatpush3.bf16.msra.mxu0 %v2902_v43  ;;  %2663 = vmatprep.subr.bf16.mxu1 %v2830_v48 }
  0xf5   :  { %2558 = vmatprep.subr.bf16.mxu0 %v2925_v59 }
  0xf7   :  { %2664 = vmatpush3.bf16.msra.mxu1 %v2830_v48 }
  0xf8   :  { %2560 = vmatpush3.bf16.msra.mxu0 %v2925_v59  ;;  %2665 = vmatprep.subr.bf16.mxu1 %v2830_v48 }
  0xf9   :  { %2562 = vmatprep.subr.bf16.mxu0 %v2945_v10 }
  0xfa   :  { %2279 = vmatmul.mubr.f32.vlgmr.msra.gmra.mrb[2].mxu1 %v834_v26 }
  0xfb   :  { %2666 = vmatpush3.bf16.msra.mxu1 %v2830_v48  ;;  %2318 = vmatprep.mubr.f32.mxu1 %v3129_v1 }
  0xfc   :  { %2564 = vmatpush3.bf16.msra.mxu0 %v2945_v10  ;;  %2667 = vmatprep.subr.bf16.mxu1 %v2830_v48 }
  0xfd   :  { %2566 = vmatprep.subr.bf16.mxu0 %v2968_v31 }
  0xff   :  { %2668 = vmatpush3.bf16.msra.mxu1 %v2830_v48 }
 0x100   :  { %2568 = vmatpush3.bf16.msra.mxu0 %v2968_v31  ;;  %2669 = vmatprep.subr.bf16.mxu1 %v2830_v48 }
 0x101   :  { %2570 = vmatprep.subr.bf16.mxu0 %v2569_v0 }
 0x103   :  { %2129 = vmatmul.mubr.f32.vlgmr.msra.gmra.mrb[0].mxu0 %v156_v40  ;;  %2670 = vmatpush3.bf16.msra.mxu1 %v2830_v48 }
 0x104   :  { %2572 = vmatpush3.bf16.msra.mxu0 %v2569_v0  ;;  %2163 = vmatprep.mubr.msk.f32.mxu0 %vm41_vm0, %v2829_v8 }
 0x105   :  { %2574 = vmatprep.subr.bf16.mxu0 %v2573_v39  ;;  %2671 = vmatprep.subr.bf16.mxu1 %v2830_v48 }
 0x107   :  { %2672 = vmatpush3.bf16.msra.mxu1 %v2830_v48 }
 0x108   :  { %2576 = vmatpush3.bf16.msra.mxu0 %v2573_v39  ;;  %2673 = vmatprep.subr.bf16.mxu1 %v2830_v48 }
 0x109   :  { %2578 = vmatprep.subr.bf16.mxu0 %v2577_v24 }
 0x10b   :  { %2674 = vmatpush3.bf16.msra.mxu1 %v2830_v48 }
 0x10c   :  { %2580 = vmatpush3.bf16.msra.mxu0 %v2577_v24  ;;  %2675 = vmatprep.subr.bf16.mxu1 %v2830_v48 }
 0x10d   :  { %2582 = vmatprep.subr.bf16.mxu0 %v2581_v25 }
 0x10f   :  { %2676 = vmatpush3.bf16.msra.mxu1 %v2830_v48 }
 0x110   :  { %2584 = vmatpush3.bf16.msra.mxu0 %v2581_v25  ;;  %2677 = vmatprep.subr.bf16.mxu1 %v2830_v48 }
 0x111   :  { %2586 = vmatprep.subr.bf16.mxu0 %v2585_v35 }
 0x113   :  { %2678 = vmatpush3.bf16.msra.mxu1 %v2830_v48 }
 0x114   :  { %2588 = vmatpush3.bf16.msra.mxu0 %v2585_v35  ;;  %2679 = vmatprep.subr.bf16.mxu1 %v2830_v48 }
 0x115   :  { %2590 = vmatprep.subr.bf16.mxu0 %v2589_v45 }
 0x117   :  { %2680 = vmatpush3.bf16.msra.mxu1 %v2830_v48 }
 0x118   :  { %2592 = vmatpush3.bf16.msra.mxu0 %v2589_v45  ;;  %2681 = vmatprep.subr.bf16.mxu1 %v2830_v48 }
 0x119   :  { %2594 = vmatprep.subr.bf16.mxu0 %v2593_v50 }
 0x11a   :  { %2319 = vmatmul.mubr.f32.vlgmr.msra.gmra.mrb[4].mxu1 %v3141_v22 }
 0x11b   :  { %2682 = vmatpush3.bf16.msra.mxu1 %v2830_v48 }
 0x11c   :  { %2596 = vmatpush3.bf16.msra.mxu0 %v2593_v50  ;;  %2683 = vmatprep.subr.bf16.mxu1 %v2830_v48 }
 0x11d   :  { %2598 = vmatprep.subr.bf16.mxu0 %v2597_v58 }
 0x11f   :  { %2684 = vmatpush3.bf16.msra.mxu1 %v2830_v48 }
 0x120   :  { %2600 = vmatpush3.bf16.msra.mxu0 %v2597_v58  ;;  %2685 = vmatprep.subr.bf16.mxu1 %v2830_v48 }
 0x121   :  { %2602 = vmatprep.subr.bf16.mxu0 %v2870_v13 }
 0x123   :  { %2164 = vmatmul.mubr.msk.f32.vlgmr.msra.gmra.mrb[0].mxu0 %vm42_vm1, %v2829_v8  ;;  %2686 = vmatpush3.bf16.msra.mxu1 %v2830_v48 }
 0x124   :  { %2604 = vmatpush3.bf16.msra.mxu0 %v2870_v13  ;;  %2198 = vmatprep.mubr.msk.f32.mxu0 %vm41_vm0, %v2829_v8 }
 0x125   :  { %2606 = vmatprep.subr.bf16.mxu0 %v2872_v14  ;;  %2687 = vmatprep.subr.bf16.mxu1 %v2830_v48 }
 0x127   :  { %2688 = vmatpush3.bf16.msra.mxu1 %v2830_v48 }
 0x128   :  { %2608 = vmatpush3.bf16.msra.mxu0 %v2872_v14  ;;  %2689 = vmatprep.subr.bf16.mxu1 %v2830_v48 }
 0x129   :  { %2610 = vmatprep.subr.bf16.mxu0 %v2877_v19 }
 0x12b   :  { %2690 = vmatpush3.bf16.msra.mxu1 %v2830_v48 }
 0x12c   :  { %2612 = vmatpush3.bf16.msra.mxu0 %v2877_v19  ;;  %2691 = vmatprep.subr.bf16.mxu1 %v2830_v48 }
 0x12d   :  { %2614 = vmatprep.subr.bf16.mxu0 %v2887_v29 }
 0x12f   :  { %2692 = vmatpush3.bf16.msra.mxu1 %v2830_v48 }
 0x130   :  { %2616 = vmatpush3.bf16.msra.mxu0 %v2887_v29  ;;  %2693 = vmatprep.subr.bf16.mxu1 %v2830_v48 }
 0x131   :  { %2618 = vmatprep.subr.bf16.mxu0 %v2902_v43 }
 0x133   :  { %2694 = vmatpush3.bf16.msra.mxu1 %v2830_v48 }
 0x134   :  { %2620 = vmatpush3.bf16.msra.mxu0 %v2902_v43  ;;  %2695 = vmatprep.subr.bf16.mxu1 %v2830_v48 }
 0x135   :  { %2622 = vmatprep.subr.bf16.mxu0 %v2925_v59 }
 0x137   :  { %2696 = vmatpush3.bf16.msra.mxu1 %v2830_v48 }
 0x138   :  { %2624 = vmatpush3.bf16.msra.mxu0 %v2925_v59  ;;  %2356 = vmatprep.subr.mxu1 %v2828_v55 }
 0x139   :  { %2626 = vmatprep.subr.bf16.mxu0 %v2945_v10 }
 0x13c   :  { %2628 = vmatpush3.bf16.msra.mxu0 %v2945_v10 }
 0x13d   :  { %2630 = vmatprep.subr.bf16.mxu0 %v2968_v31 }
 0x140   :  { %2632 = vmatpush3.bf16.msra.mxu0 %v2968_v31 }
 0x141   :  { %2236 = vmatprep.subr.mxu0 %v2828_v55 }
 0x143   :  { %2199 = vmatmul.mubr.msk.f32.vlgmr.msra.gmra.mrb[0].mxu0 %vm42_vm1, %v2829_v8 }
 0x144   :  { %2237 = vmatpush3.msra.mxu0 %v2828_v55  ;;  %2238 = vmatprep.mubr.f32.mxu0 %v3129_v1 }
 0x145   :  { %2241 = vmatprep.subr.mxu0 %v2828_v55 }
 0x147   :  { %2239 = vmatmul.mubr.f32.vlgmr.msra.gmra.mrb[2].mxu0 %v3141_v22 }
 0x148   :  { %2242 = vmatpush3.msra.mxu0 %v2828_v55  ;;  %2243 = vmatprep.mubr.f32.mxu0 %v3135_v12 }
 0x149   :  { %2281 = vmatprep.subr.mxu0 %v2828_v55 }
 0x14f   :  { %2244 = vmatmul.mubr.f32.vlgmr.msra.gmra.mrb[2].mxu0 %v3148_v33 }
 0x150   :  { %2282 = vmatpush3.msra.mxu0 %v2828_v55  ;;  %2283 = vmatprep.mubr.f32.mxu0 %v3129_v1 }
 0x153   :  { %2284 = vmatmul.mubr.f32.vlgmr.msra.gmra.mrb[4].mxu0 %v3141_v22 }
 0x1ad   :  { %v2235_v13 = vpop.f32.mrb[0].mxu1 }
 0x1ae   :  { %v828_v14 = vpop.f32.mrb[1].mxu1 }
 0x1cd   :  { %v2280_v19 = vpop.f32.mrb[2].mxu1 }
 0x1ce   :  { %v1067_v29 = vpop.f32.mrb[3].mxu1 }
 0x1ed   :  { %v2320_v43 = vpop.f32.mrb[4].mxu1 }
 0x1ee   :  { %v1223_v59 = vpop.f32.mrb[5].mxu1 }
 0x216   :  { %v2200_v60 = vpop.f32.mrb[0].mxu0 }
 0x217   :  { %v1234_v61 = vmul.f32 %v3137_v17, %v2200_v60  ;;  %v737_v2 = vpop.f32.mrb[1].mxu0 }
 0x218   :  { %v1233_v3 = vmul.f32 %v3126_v62, %v737_v2 }
 0x219   :  { %v3287_v8 = vand.u32 4294901760, %v1234_v61 }
 0x21a   :  { %v1300_v10 = vand.u32 4294901760, %v1233_v3 }
 0x21b   :  { %v1311_v20 = vsub.f32 %v1234_v61, %v3287_v8 }
 0x21c   :  { %v1301_v21 = vsub.f32 %v1233_v3, %v1300_v10 }
 0x21d   :  { %v1312_v31 = vand.u32 4294901760, %v1311_v20 }
 0x21e   :  { %v1302_v40 = vand.u32 4294901760, %v1301_v21 }
 0x21f   :  { %v1313_v32 = vsub.f32 %v1311_v20, %v1312_v31 }
 0x220   :  { %v1303_v36 = vsub.f32 %v1301_v21, %v1302_v40 }
 0x221   :  { %v1314_v54 = vand.u32 4294901760, %v1313_v32 }
 0x222   :  { %v1304_v56 = vand.u32 4294901760, %v1303_v36  ;;  %v2245_v52 = vpop.f32.mrb[2].mxu0 }
 0x223   :  { %v2729_v15 = vadd.f32 %v2245_v52, %v2235_v13  ;;  %v987_v44 = vpop.f32.mrb[3].mxu0 }
 0x224   :  { %2353 = vmatprep.mubr.f32.mxu1 %v1304_v56  ;;  %v2733_v7 = vadd.f32 %v987_v44, %v828_v14 }
 0x225   :  { %2354 = vmatmul.mubr.f32.vlgmr.msra.gmra.mrb[6].mxu1 %v1314_v54  ;;  %v2730_v18 = vadd.f32 %v2729_v15, %v2280_v19 }
 0x226   :  { %2357 = vmatpush3.msra.mxu1 %v2828_v55  ;;  %2358 = vmatprep.mubr.f32.mxu1 %v1300_v10  ;;  %v2734_v4 = vadd.f32 %v2733_v7, %v1067_v29  ;;  %v2285_v6 = vpop.f32.mrb[4].mxu0 }
 0x227   :  { %2361 = vmatprep.subr.mxu1 %v2828_v55  ;;  %v2731_v63 = vadd.f32 %v2730_v18, %v2285_v6  ;;  %v1146_v5 = vpop.f32.mrb[5].mxu0 }
 0x228   :  { %v2735_v9 = vadd.f32 %v2734_v4, %v1146_v5 }
 0x229   :  { %v2732_v16 = vadd.f32 %v2731_v63, %v2320_v43 }
 0x22a   :  { %v2736_v30 = vadd.f32 %v2735_v9, %v1223_v59 }
 0x22b   :  { %2772 = vrcp.f32 %v2732_v16 }
 0x22c   :  { %2774 = vrcp.f32 %v2736_v30 }
 0x22d   :  { %2359 = vmatmul.mubr.f32.vlgmr.msra.gmra.mrb[6].mxu1 %v3287_v8 }
 0x22e   :  { %2362 = vmatpush3.msra.mxu1 %v2828_v55  ;;  %2363 = vmatprep.mubr.f32.mxu1 %v1301_v21 }
 0x22f   :  { %2697 = vmatprep.subr.bf16.mxu1 %v2830_v48 }
 0x235   :  { %2364 = vmatmul.mubr.f32.vlgmr.msra.gmra.mrb[6].mxu1 %v1311_v20 }
 0x236   :  { %2698 = vmatpush3.bf16.msra.mxu1 %v2830_v48  ;;  %2398 = vmatprep.mubr.f32.mxu1 %v1302_v40 }
 0x237   :  { %2699 = vmatprep.subr.bf16.mxu1 %v2830_v48 }
 0x23a   :  { %2700 = vmatpush3.bf16.msra.mxu1 %v2830_v48 }
 0x23b   :  { %2701 = vmatprep.subr.bf16.mxu1 %v2830_v48 }
 0x23e   :  { %2702 = vmatpush3.bf16.msra.mxu1 %v2830_v48 }
 0x23f   :  { %2703 = vmatprep.subr.bf16.mxu1 %v2830_v48 }
 0x242   :  { %2704 = vmatpush3.bf16.msra.mxu1 %v2830_v48 }
 0x243   :  { %2705 = vmatprep.subr.bf16.mxu1 %v2830_v48 }
 0x246   :  { %2706 = vmatpush3.bf16.msra.mxu1 %v2830_v48 }
 0x247   :  { %2707 = vmatprep.subr.bf16.mxu1 %v2830_v48 }
 0x24a   :  { %2708 = vmatpush3.bf16.msra.mxu1 %v2830_v48 }
 0x24b   :  { %2709 = vmatprep.subr.bf16.mxu1 %v2830_v48 }
 0x24e   :  { %2710 = vmatpush3.bf16.msra.mxu1 %v2830_v48 }
 0x24f   :  { %2711 = vmatprep.subr.bf16.mxu1 %v2830_v48 }
 0x252   :  { %2712 = vmatpush3.bf16.msra.mxu1 %v2830_v48 }
 0x253   :  { %2401 = vmatprep.subr.mxu1 %v2828_v55 }
 0x255   :  { %2399 = vmatmul.mubr.f32.vlgmr.msra.gmra.mrb[6].mxu1 %v1312_v31 }
 0x256   :  { %2402 = vmatpush3.msra.mxu1 %v2828_v55  ;;  %2403 = vmatprep.mubr.f32.mxu1 %v1300_v10  ;;  %v2773_v55 = vpop.eup %2772 }
 0x257   :  { %2713 = vmatprep.subr.bf16.mxu1 %v2830_v48  ;;  %v2775_v53 = vpop.eup %2774 }
 0x25d   :  { %2404 = vmatmul.mubr.f32.vlgmr.msra.gmra.mrb[6].mxu1 %v3287_v8 }
 0x25e   :  { %2714 = vmatpush3.bf16.msra.mxu1 %v2830_v48  ;;  %2438 = vmatprep.mubr.f32.mxu1 %v1300_v10 }
 0x25f   :  { %2715 = vmatprep.subr.bf16.mxu1 %v2830_v48 }
 0x262   :  { %2716 = vmatpush3.bf16.msra.mxu1 %v2830_v48 }
 0x263   :  { %2717 = vmatprep.subr.bf16.mxu1 %v2830_v48 }
 0x266   :  { %2718 = vmatpush3.bf16.msra.mxu1 %v2830_v48 }
 0x267   :  { %2719 = vmatprep.subr.bf16.mxu1 %v2830_v48 }
 0x26a   :  { %2720 = vmatpush3.bf16.msra.mxu1 %v2830_v48 }
 0x26b   :  { %2721 = vmatprep.subr.bf16.mxu1 %v2830_v48 }
 0x26e   :  { %2722 = vmatpush3.bf16.msra.mxu1 %v2830_v48 }
 0x26f   :  { %2723 = vmatprep.subr.bf16.mxu1 %v2830_v48 }
 0x272   :  { %2724 = vmatpush3.bf16.msra.mxu1 %v2830_v48 }
 0x273   :  { %2725 = vmatprep.subr.bf16.mxu1 %v2830_v48 }
 0x276   :  { %2726 = vmatpush3.bf16.msra.mxu1 %v2830_v48 }
 0x277   :  { %2727 = vmatprep.subr.bf16.mxu1 %v2830_v48 }
 0x27a   :  { %2728 = vmatpush3.bf16.msra.mxu1 %v2830_v48 }
 0x27d   :  { %2439 = vmatmul.mubr.f32.vlgmr.msra.gmra.mrb[6].mxu1 %v3287_v8 }
 0x350   :  { %v2440_v41 = vpop.f32.mrb[6].mxu1 }
 0x351   :  { %v1714_v62 = vmul.f32 %v2773_v55, %v2440_v41  ;;  %v1701_v1 = vpop.f32.mrb[7].mxu1 }
 0x352   :  { %v1713_v12 = vmul.f32 %v2775_v53, %v1701_v1 }
 0x354   :  { %v1726_v17 = vadd.f32 %v1714_v62, %v1713_v12 }
 0x356   :  { %v1727_v11 = vrot.slane %v1726_v17, 4 }
 0x358   :  { %v1728_v22 = vadd.f32 %v1727_v11, %v1726_v17 }
 0x35a   :  { %v1729_v23 = vrot.slane %v1728_v22, 2 }
 0x35c   :  { %v1730_v33 = vadd.f32 %v1729_v23, %v1728_v22 }
 0x35e   :  { %v1731_v34 = vrot.slane %v1730_v33, 1 }
 0x360   :  { %v1732_v26 = vadd.f32 %v1731_v34, %v1730_v33 }
 0x362   :  { %1733 = vst [vmem:[#allocation5] sm:$0xff] %v1732_v26 }
 0x363   :  { %2809 = shalt.err (!%p2806_p12)
}
 0x364   :  { %s2810_s9 = scalar_lea.hbm %s3345_s3, 128 }
 0x365   :  { %p2811_p13 = scmp.ne.s32.totalorder %s3345_s3, %s2810_s9  ;;  %p2814_p0 = scmp.lt.u32.totalorder %s2810_s9, %s3345_s3 }
 0x367   :  { %p2816_p1 = pnand %p2814_p0, %p2811_p13 }
 0x369   :  { %2819 = shalt.err (!%p2816_p1)
}
 0x36a   :  { %1743 = dma.vmem_to_hbm [thread:$0]  %s1741_s5, 128, %s3345_s3, [#allocation4]  }
 0x36b   :  { %2822 = dma.done.wait [#allocation4], 128  }
 0x36c   :  { %2823 = vsyncadd [#allocation4], 4294967168 }
 0x36d   :  { %1747 = vsyncpa [#allocation3], 1 }
 0x36e   :  { %1748 = vsyncpa [#allocation4], 1 }

</bundles_post_ra>
